<compile_context>
chip_gen: v6e
topology: v6e:2x2x1
jax: 0.10.0
libtpu: 0.0.40
codegen_flags: <defaults>
</compile_context>

<pallas_src>
import jax
import jax.numpy as jnp
from jax.experimental import pallas as pl
from jax.experimental.pallas import tpu as pltpu


# ----------------------------------------------------------------------------
# Kernel
# ----------------------------------------------------------------------------
def mlp_kernel(x_ref, w1_ref, b1_ref, w2_ref, b2_ref, w3_ref, b3_ref, o_ref):
    # layer1: bf16 MXU matmul, f32 accumulate; bias + ReLU in f32 on the VPU
    h = jnp.dot(x_ref[...], w1_ref[...], preferred_element_type=jnp.float32)
    h = jnp.maximum(h + b1_ref[...], 0.0)
    # layer2
    h = jnp.dot(h.astype(w2_ref.dtype), w2_ref[...],
                preferred_element_type=jnp.float32)
    h = jnp.maximum(h + b2_ref[...], 0.0)
    # layer3 (no activation); lane-dense (padded-to-128) store
    h = jnp.dot(h.astype(w3_ref.dtype), w3_ref[...],
                preferred_element_type=jnp.float32)
    o_ref[...] = (h + b3_ref[...]).astype(o_ref.dtype)


# ----------------------------------------------------------------------------
# Helpers
# ----------------------------------------------------------------------------
def _round_up(n, m):
    return (n + m - 1) // m * m


def _pad2d(a, rows, cols):
    return jnp.pad(a, ((0, rows - a.shape[0]), (0, cols - a.shape[1])))


def _auto_tile_b(B):
    """Largest multiple-of-8 batch tile (<=512); keep >=2 grid steps when B allows."""
    tile_b = min(512, _round_up(B, 8))
    if B > 8 and pl.cdiv(B, tile_b) < 2:
        tile_b = max(8, _round_up(pl.cdiv(B, 2), 8))
    return tile_b


def _build_call(B, in_p, hid_p, out_p, tile_b, vmem_limit, single_buffer_weights):
    # Constant-index weight/bias blocks: request single buffering so we do not
    # pay 2x VMEM for arrays whose block never changes.
    wk = {"pipeline_mode": pl.Buffered(1)} if single_buffer_weights else {}
    grid = (pl.cdiv(B, tile_b),)
    return pl.pallas_call(
        mlp_kernel,
        out_shape=jax.ShapeDtypeStruct((B, out_p), jnp.float32),
        grid_spec=pltpu.PrefetchScalarGridSpec(
            num_scalar_prefetch=0,
            grid=grid,
            in_specs=[
                # x tiled over the batch axis
                pl.BlockSpec((tile_b, in_p), lambda i: (i, 0)),
                # weights / biases fully resident (constant index maps)
                pl.BlockSpec((in_p, hid_p), lambda i: (0, 0), **wk),
                pl.BlockSpec((1, hid_p), lambda i: (0, 0), **wk),
                pl.BlockSpec((hid_p, hid_p), lambda i: (0, 0), **wk),
                pl.BlockSpec((1, hid_p), lambda i: (0, 0), **wk),
                pl.BlockSpec((hid_p, out_p), lambda i: (0, 0), **wk),
                pl.BlockSpec((1, out_p), lambda i: (0, 0), **wk),
            ],
            out_specs=pl.BlockSpec((tile_b, out_p), lambda i: (i, 0)),
        ),
        compiler_params=pltpu.CompilerParams(
            dimension_semantics=("parallel",),
            vmem_limit_bytes=vmem_limit,
        ),
    )


# ----------------------------------------------------------------------------
# Wrapper
# ----------------------------------------------------------------------------
def neural_net_forward(x, params, *, tile_b=None, mxu_dtype=jnp.bfloat16):
    """Forward pass of the 3-layer MLP as one fused Pallas kernel.

    x: [B, input_size] float32
    params: w1 [in,hid], b1 [1,hid], w2 [hid,hid], b2 [1,hid],
            w3 [hid,out], b3 [1,out]   (weights transposed vs nn.Linear)
    """
    B, in_dim = x.shape
    hid = params["w1"].shape[1]
    out_dim = params["w3"].shape[1]

    # Pad every feature dim to a multiple of 128 (lane-dense matmuls & stores).
    in_p = _round_up(in_dim, 128)
    hid_p = _round_up(hid, 128)
    out_p = _round_up(out_dim, 128)

    if tile_b is None:
        tile_b = _auto_tile_b(B)

    # bf16 operands for the MXU; zero padding keeps the math identical.
    x_pd = _pad2d(x, B, in_p).astype(mxu_dtype)
    w1 = _pad2d(params["w1"], in_p, hid_p).astype(mxu_dtype)
    w2 = _pad2d(params["w2"], hid_p, hid_p).astype(mxu_dtype)
    w3 = _pad2d(params["w3"], hid_p, out_p).astype(mxu_dtype)
    b1 = _pad2d(params["b1"], 1, hid_p).astype(jnp.float32)
    b2 = _pad2d(params["b2"], 1, hid_p).astype(jnp.float32)
    b3 = _pad2d(params["b3"], 1, out_p).astype(jnp.float32)

    # VMEM budget estimate: double-buffered x/out tiles + (worst case double-
    # buffered) weights/biases + f32 intermediates.  Capped at 64 MiB (v7x).
    w_bytes = 2 * (in_p * hid_p + hid_p * hid_p + hid_p * out_p) * 2
    b_bytes = 2 * (2 * hid_p + out_p) * 4
    io_bytes = 2 * (tile_b * in_p * 2 + tile_b * out_p * 4)
    h_bytes = 2 * tile_b * hid_p * 4
    vmem_limit = int(min(64 << 20, max(32 << 20,
                                       2 * (w_bytes + b_bytes + io_bytes + h_bytes))))

    args = (x_pd, w1, b1, w2, b2, w3, b3)
    try:
        out_padded = _build_call(B, in_p, hid_p, out_p, tile_b, vmem_limit,
                                 single_buffer_weights=True)(*args)
    except Exception:
        # pipeline_mode=pl.Buffered(1) not supported on this jax build; fall
        # back to default (double-buffered) specs — correctness is identical.
        out_padded = _build_call(B, in_p, hid_p, out_p, tile_b, vmem_limit,
                                 single_buffer_weights=False)(*args)

    # Slice the lane-padded classes back to the true output width.
    return out_padded[:, :out_dim]


# ----------------------------------------------------------------------------
# Params / reference
# ----------------------------------------------------------------------------
def init_params(key, input_size, hidden_size, num_classes):
    """Deterministic init mimicking nn.Linear's uniform(-1/sqrt(fan_in), +)."""
    ks = jax.random.split(key, 6)

    def lin(kw, kb, fan_in, fan_out):
        bound = 1.0 / jnp.sqrt(jnp.float32(fan_in))
        w = jax.random.uniform(kw, (fan_in, fan_out), jnp.float32, -bound, bound)
        b = jax.random.uniform(kb, (1, fan_out), jnp.float32, -bound, bound)
        return w, b

    w1, b1 = lin(ks[0], ks[1], input_size, hidden_size)
    w2, b2 = lin(ks[2], ks[3], hidden_size, hidden_size)
    w3, b3 = lin(ks[4], ks[5], hidden_size, num_classes)
    return {"w1": w1, "b1": b1, "w2": w2, "b2": b2, "w3": w3, "b3": b3}


def reference_forward(x, p, mxu_dtype=jnp.bfloat16):
    """Pure-JAX reference using the same bf16-operand / f32-accumulate math."""
    def lin(a, w, b):
        return jnp.dot(a.astype(mxu_dtype), w.astype(mxu_dtype),
                       preferred_element_type=jnp.float32) + b
    h = jnp.maximum(lin(x, p["w1"], p["b1"]), 0.0)
    h = jnp.maximum(lin(h, p["w2"], p["b2"]), 0.0)
    return lin(h, p["w3"], p["b3"])


# ----------------------------------------------------------------------------
# Self-test
# ----------------------------------------------------------------------------
if __name__ == "__main__":
    key = jax.random.PRNGKey(0)
    kx, kp = jax.random.split(key)

    batch, input_size, hidden_size, num_classes = 32, 32, 32, 16
    x = jax.random.normal(kx, (batch, input_size), jnp.float32)
    params = init_params(kp, input_size, hidden_size, num_classes)

    out = neural_net_forward(x, params)
    out = jax.block_until_ready(out)

    ref = reference_forward(x, params)
    assert out.shape == (batch, num_classes), out.shape
    assert jnp.allclose(out, ref, atol=1e-3, rtol=1e-3), \
        float(jnp.max(jnp.abs(out - ref)))

    print("KERNEL_OK")
</pallas_src>

<mosaic_0001>
module attributes {stable_mosaic.version = 11 : i64} {
  func.func @mlp_kernel(%arg0: i32, %arg1: memref<16x128xbf16, #tpu.memory_space<vmem>>, %arg2: memref<128x128xbf16, #tpu.memory_space<vmem>>, %arg3: memref<1x128xf32, #tpu.memory_space<vmem>>, %arg4: memref<128x128xbf16, #tpu.memory_space<vmem>>, %arg5: memref<1x128xf32, #tpu.memory_space<vmem>>, %arg6: memref<128x128xbf16, #tpu.memory_space<vmem>>, %arg7: memref<1x128xf32, #tpu.memory_space<vmem>>, %arg8: memref<16x128xf32, #tpu.memory_space<vmem>>) attributes {dimension_semantics = [#tpu.dimension_semantics<parallel>], iteration_bounds = array<i64: 2>, scalar_prefetch = 0 : i64, scratch_operands = 0 : i64, tpu.core_type = #tpu.core_type<tc>, window_params = [{transform_indices = @transform_0, window_bounds = array<i64: 16, 128>}, {pipeline_mode = #tpu.pipeline_mode<synchronous>, transform_indices = @transform_1, window_bounds = array<i64: 128, 128>}, {pipeline_mode = #tpu.pipeline_mode<synchronous>, transform_indices = @transform_2, window_bounds = array<i64: 1, 128>}, {pipeline_mode = #tpu.pipeline_mode<synchronous>, transform_indices = @transform_3, window_bounds = array<i64: 128, 128>}, {pipeline_mode = #tpu.pipeline_mode<synchronous>, transform_indices = @transform_4, window_bounds = array<i64: 1, 128>}, {pipeline_mode = #tpu.pipeline_mode<synchronous>, transform_indices = @transform_5, window_bounds = array<i64: 128, 128>}, {pipeline_mode = #tpu.pipeline_mode<synchronous>, transform_indices = @transform_6, window_bounds = array<i64: 1, 128>}, {transform_indices = @transform_7, window_bounds = array<i64: 16, 128>}]} {
    %c0 = arith.constant 0 : index
    %c0_0 = arith.constant 0 : index
    %0 = vector.load %arg1[%c0, %c0_0] : memref<16x128xbf16, #tpu.memory_space<vmem>>, vector<16x128xbf16>
    %c0_1 = arith.constant 0 : index
    %c0_2 = arith.constant 0 : index
    %1 = vector.load %arg2[%c0_1, %c0_2] : memref<128x128xbf16, #tpu.memory_space<vmem>>, vector<128x128xbf16>
    %cst = arith.constant dense<0.000000e+00> : vector<16x128xf32>
    %2 = tpu.matmul %0, %1, %cst {dimension_numbers = #tpu.dot_dimension_numbers<[1], [0], [0], [1], [0, 0, 1, 1], [], []>} : vector<16x128xbf16>, vector<128x128xbf16>, vector<16x128xf32> -> vector<16x128xf32>
    %c0_3 = arith.constant 0 : index
    %c0_4 = arith.constant 0 : index
    %3 = vector.load %arg3[%c0_3, %c0_4] : memref<1x128xf32, #tpu.memory_space<vmem>>, vector<1x128xf32>
    %4 = vector.broadcast %3 : vector<1x128xf32> to vector<16x128xf32>
    %5 = arith.addf %2, %4 : vector<16x128xf32>
    %cst_5 = arith.constant 0.000000e+00 : f32
    %6 = vector.broadcast %cst_5 : f32 to vector<16x128xf32>
    %7 = arith.maximumf %5, %6 : vector<16x128xf32>
    %8 = arith.truncf %7 : vector<16x128xf32> to vector<16x128xbf16>
    %c0_6 = arith.constant 0 : index
    %c0_7 = arith.constant 0 : index
    %9 = vector.load %arg4[%c0_6, %c0_7] : memref<128x128xbf16, #tpu.memory_space<vmem>>, vector<128x128xbf16>
    %cst_8 = arith.constant dense<0.000000e+00> : vector<16x128xf32>
    %10 = tpu.matmul %8, %9, %cst_8 {dimension_numbers = #tpu.dot_dimension_numbers<[1], [0], [0], [1], [0, 0, 1, 1], [], []>} : vector<16x128xbf16>, vector<128x128xbf16>, vector<16x128xf32> -> vector<16x128xf32>
    %c0_9 = arith.constant 0 : index
    %c0_10 = arith.constant 0 : index
    %11 = vector.load %arg5[%c0_9, %c0_10] : memref<1x128xf32, #tpu.memory_space<vmem>>, vector<1x128xf32>
    %12 = vector.broadcast %11 : vector<1x128xf32> to vector<16x128xf32>
    %13 = arith.addf %10, %12 : vector<16x128xf32>
    %cst_11 = arith.constant 0.000000e+00 : f32
    %14 = vector.broadcast %cst_11 : f32 to vector<16x128xf32>
    %15 = arith.maximumf %13, %14 : vector<16x128xf32>
    %16 = arith.truncf %15 : vector<16x128xf32> to vector<16x128xbf16>
    %c0_12 = arith.constant 0 : index
    %c0_13 = arith.constant 0 : index
    %17 = vector.load %arg6[%c0_12, %c0_13] : memref<128x128xbf16, #tpu.memory_space<vmem>>, vector<128x128xbf16>
    %cst_14 = arith.constant dense<0.000000e+00> : vector<16x128xf32>
    %18 = tpu.matmul %16, %17, %cst_14 {dimension_numbers = #tpu.dot_dimension_numbers<[1], [0], [0], [1], [0, 0, 1, 1], [], []>} : vector<16x128xbf16>, vector<128x128xbf16>, vector<16x128xf32> -> vector<16x128xf32>
    %c0_15 = arith.constant 0 : index
    %c0_16 = arith.constant 0 : index
    %19 = vector.load %arg7[%c0_15, %c0_16] : memref<1x128xf32, #tpu.memory_space<vmem>>, vector<1x128xf32>
    %20 = vector.broadcast %19 : vector<1x128xf32> to vector<16x128xf32>
    %21 = arith.addf %18, %20 : vector<16x128xf32>
    %c0_17 = arith.constant 0 : index
    %c0_18 = arith.constant 0 : index
    %22 = vector.load %arg8[%c0_17, %c0_18] : memref<16x128xf32, #tpu.memory_space<vmem>>, vector<16x128xf32>
    tpu.vector_store %arg8[%c0_17, %c0_18], %21 {strides = array<i32>} : memref<16x128xf32, #tpu.memory_space<vmem>>, vector<16x128xf32>,
    return
  }
  func.func @transform_0(%arg0: i32) -> (i32, i32) {
    %c0_i32 = arith.constant 0 : i32
    %c0_i32_0 = arith.constant 0 : i32
    return %arg0, %c0_i32 : i32, i32
  }
  func.func @transform_1(%arg0: i32) -> (i32, i32) {
    %c0_i32 = arith.constant 0 : i32
    %c0_i32_0 = arith.constant 0 : i32
    %c0_i32_1 = arith.constant 0 : i32
    return %c0_i32, %c0_i32_0 : i32, i32
  }
  func.func @transform_2(%arg0: i32) -> (i32, i32) {
    %c0_i32 = arith.constant 0 : i32
    %c0_i32_0 = arith.constant 0 : i32
    %c0_i32_1 = arith.constant 0 : i32
    return %c0_i32, %c0_i32_0 : i32, i32
  }
  func.func @transform_3(%arg0: i32) -> (i32, i32) {
    %c0_i32 = arith.constant 0 : i32
    %c0_i32_0 = arith.constant 0 : i32
    %c0_i32_1 = arith.constant 0 : i32
    return %c0_i32, %c0_i32_0 : i32, i32
  }
  func.func @transform_4(%arg0: i32) -> (i32, i32) {
    %c0_i32 = arith.constant 0 : i32
    %c0_i32_0 = arith.constant 0 : i32
    %c0_i32_1 = arith.constant 0 : i32
    return %c0_i32, %c0_i32_0 : i32, i32
  }
  func.func @transform_5(%arg0: i32) -> (i32, i32) {
    %c0_i32 = arith.constant 0 : i32
    %c0_i32_0 = arith.constant 0 : i32
    %c0_i32_1 = arith.constant 0 : i32
    return %c0_i32, %c0_i32_0 : i32, i32
  }
  func.func @transform_6(%arg0: i32) -> (i32, i32) {
    %c0_i32 = arith.constant 0 : i32
    %c0_i32_0 = arith.constant 0 : i32
    %c0_i32_1 = arith.constant 0 : i32
    return %c0_i32, %c0_i32_0 : i32, i32
  }
  func.func @transform_7(%arg0: i32) -> (i32, i32) {
    %c0_i32 = arith.constant 0 : i32
    %c0_i32_0 = arith.constant 0 : i32
    return %arg0, %c0_i32 : i32, i32
  }
}

module attributes {stable_mosaic.version = 11 : i64} {
  func.func @mlp_kernel(%arg0: i32, %arg1: memref<16x128xbf16, #tpu.memory_space<vmem>>, %arg2: memref<128x128xbf16, #tpu.memory_space<vmem>>, %arg3: memref<1x128xf32, #tpu.memory_space<vmem>>, %arg4: memref<128x128xbf16, #tpu.memory_space<vmem>>, %arg5: memref<1x128xf32, #tpu.memory_space<vmem>>, %arg6: memref<128x128xbf16, #tpu.memory_space<vmem>>, %arg7: memref<1x128xf32, #tpu.memory_space<vmem>>, %arg8: memref<16x128xf32, #tpu.memory_space<vmem>>) attributes {dimension_semantics = [#tpu.dimension_semantics<parallel>], iteration_bounds = array<i64: 2>, scalar_prefetch = 0 : i64, scratch_operands = 0 : i64, tpu.core_type = #tpu.core_type<tc>, window_params = [{transform_indices = @transform_0, window_bounds = array<i64: 16, 128>}, {pipeline_mode = #tpu.pipeline_mode<synchronous>, transform_indices = @transform_1, window_bounds = array<i64: 128, 128>}, {pipeline_mode = #tpu.pipeline_mode<synchronous>, transform_indices = @transform_2, window_bounds = array<i64: 1, 128>}, {pipeline_mode = #tpu.pipeline_mode<synchronous>, transform_indices = @transform_3, window_bounds = array<i64: 128, 128>}, {pipeline_mode = #tpu.pipeline_mode<synchronous>, transform_indices = @transform_4, window_bounds = array<i64: 1, 128>}, {pipeline_mode = #tpu.pipeline_mode<synchronous>, transform_indices = @transform_5, window_bounds = array<i64: 128, 128>}, {pipeline_mode = #tpu.pipeline_mode<synchronous>, transform_indices = @transform_6, window_bounds = array<i64: 1, 128>}, {transform_indices = @transform_7, window_bounds = array<i64: 16, 128>}]} {
    %c0 = arith.constant 0 : index
    %c0_0 = arith.constant 0 : index
    %0 = vector.load %arg1[%c0, %c0_0] : memref<16x128xbf16, #tpu.memory_space<vmem>>, vector<16x128xbf16>
    %c0_1 = arith.constant 0 : index
    %c0_2 = arith.constant 0 : index
    %1 = vector.load %arg2[%c0_1, %c0_2] : memref<128x128xbf16, #tpu.memory_space<vmem>>, vector<128x128xbf16>
    %cst = arith.constant dense<0.000000e+00> : vector<16x128xf32>
    %2 = tpu.matmul %0, %1, %cst {dimension_numbers = #tpu.dot_dimension_numbers<[1], [0], [0], [1], [0, 0, 1, 1], [], []>} : vector<16x128xbf16>, vector<128x128xbf16>, vector<16x128xf32> -> vector<16x128xf32>
    %c0_3 = arith.constant 0 : index
    %c0_4 = arith.constant 0 : index
    %3 = vector.load %arg3[%c0_3, %c0_4] : memref<1x128xf32, #tpu.memory_space<vmem>>, vector<1x128xf32>
    %4 = vector.broadcast %3 : vector<1x128xf32> to vector<16x128xf32>
    %5 = arith.addf %2, %4 : vector<16x128xf32>
    %cst_5 = arith.constant 0.000000e+00 : f32
    %6 = vector.broadcast %cst_5 : f32 to vector<16x128xf32>
    %7 = arith.maximumf %5, %6 : vector<16x128xf32>
    %8 = arith.truncf %7 : vector<16x128xf32> to vector<16x128xbf16>
    %c0_6 = arith.constant 0 : index
    %c0_7 = arith.constant 0 : index
    %9 = vector.load %arg4[%c0_6, %c0_7] : memref<128x128xbf16, #tpu.memory_space<vmem>>, vector<128x128xbf16>
    %cst_8 = arith.constant dense<0.000000e+00> : vector<16x128xf32>
    %10 = tpu.matmul %8, %9, %cst_8 {dimension_numbers = #tpu.dot_dimension_numbers<[1], [0], [0], [1], [0, 0, 1, 1], [], []>} : vector<16x128xbf16>, vector<128x128xbf16>, vector<16x128xf32> -> vector<16x128xf32>
    %c0_9 = arith.constant 0 : index
    %c0_10 = arith.constant 0 : index
    %11 = vector.load %arg5[%c0_9, %c0_10] : memref<1x128xf32, #tpu.memory_space<vmem>>, vector<1x128xf32>
    %12 = vector.broadcast %11 : vector<1x128xf32> to vector<16x128xf32>
    %13 = arith.addf %10, %12 : vector<16x128xf32>
    %cst_11 = arith.constant 0.000000e+00 : f32
    %14 = vector.broadcast %cst_11 : f32 to vector<16x128xf32>
    %15 = arith.maximumf %13, %14 : vector<16x128xf32>
    %16 = arith.truncf %15 : vector<16x128xf32> to vector<16x128xbf16>
    %c0_12 = arith.constant 0 : index
    %c0_13 = arith.constant 0 : index
    %17 = vector.load %arg6[%c0_12, %c0_13] : memref<128x128xbf16, #tpu.memory_space<vmem>>, vector<128x128xbf16>
    %cst_14 = arith.constant dense<0.000000e+00> : vector<16x128xf32>
    %18 = tpu.matmul %16, %17, %cst_14 {dimension_numbers = #tpu.dot_dimension_numbers<[1], [0], [0], [1], [0, 0, 1, 1], [], []>} : vector<16x128xbf16>, vector<128x128xbf16>, vector<16x128xf32> -> vector<16x128xf32>
    %c0_15 = arith.constant 0 : index
    %c0_16 = arith.constant 0 : index
    %19 = vector.load %arg7[%c0_15, %c0_16] : memref<1x128xf32, #tpu.memory_space<vmem>>, vector<1x128xf32>
    %20 = vector.broadcast %19 : vector<1x128xf32> to vector<16x128xf32>
    %21 = arith.addf %18, %20 : vector<16x128xf32>
    %c0_17 = arith.constant 0 : index
    %c0_18 = arith.constant 0 : index
    %22 = vector.load %arg8[%c0_17, %c0_18] : memref<16x128xf32, #tpu.memory_space<vmem>>, vector<16x128xf32>
    tpu.vector_store %arg8[%c0_17, %c0_18], %21 {strides = array<i32>} : memref<16x128xf32, #tpu.memory_space<vmem>>, vector<16x128xf32>,
    return
  }
  func.func @transform_0(%arg0: i32) -> (i32, i32) {
    %c0_i32 = arith.constant 0 : i32
    %c0_i32_0 = arith.constant 0 : i32
    return %arg0, %c0_i32 : i32, i32
  }
  func.func @transform_1(%arg0: i32) -> (i32, i32) {
    %c0_i32 = arith.constant 0 : i32
    %c0_i32_0 = arith.constant 0 : i32
    %c0_i32_1 = arith.constant 0 : i32
    return %c0_i32, %c0_i32_0 : i32, i32
  }
  func.func @transform_2(%arg0: i32) -> (i32, i32) {
    %c0_i32 = arith.constant 0 : i32
    %c0_i32_0 = arith.constant 0 : i32
    %c0_i32_1 = arith.constant 0 : i32
    return %c0_i32, %c0_i32_0 : i32, i32
  }
  func.func @transform_3(%arg0: i32) -> (i32, i32) {
    %c0_i32 = arith.constant 0 : i32
    %c0_i32_0 = arith.constant 0 : i32
    %c0_i32_1 = arith.constant 0 : i32
    return %c0_i32, %c0_i32_0 : i32, i32
  }
  func.func @transform_4(%arg0: i32) -> (i32, i32) {
    %c0_i32 = arith.constant 0 : i32
    %c0_i32_0 = arith.constant 0 : i32
    %c0_i32_1 = arith.constant 0 : i32
    return %c0_i32, %c0_i32_0 : i32, i32
  }
  func.func @transform_5(%arg0: i32) -> (i32, i32) {
    %c0_i32 = arith.constant 0 : i32
    %c0_i32_0 = arith.constant 0 : i32
    %c0_i32_1 = arith.constant 0 : i32
    return %c0_i32, %c0_i32_0 : i32, i32
  }
  func.func @transform_6(%arg0: i32) -> (i32, i32) {
    %c0_i32 = arith.constant 0 : i32
    %c0_i32_0 = arith.constant 0 : i32
    %c0_i32_1 = arith.constant 0 : i32
    return %c0_i32, %c0_i32_0 : i32, i32
  }
  func.func @transform_7(%arg0: i32) -> (i32, i32) {
    %c0_i32 = arith.constant 0 : i32
    %c0_i32_0 = arith.constant 0 : i32
    return %arg0, %c0_i32 : i32, i32
  }
}

</mosaic_0001>

<bundles_post_ra>
// kernel: tpu_custom_call.1
= control target key start
LH: loop header
LB: loop body
LE: loop exit
PB: predicated region body
PF: predicated region fallthrough
CT: control target
= control target key end

     0   :  { %s1543_s0 = inlined_call_operand.hbm [shape: bf16[32,128], index: 0, kind: input, shape index: {}]   ;;  %s1544_s1 = inlined_call_operand.hbm [shape: bf16[128,128], index: 1, kind: input, shape index: {}]   ;;  %s1545_s2 = inlined_call_operand.vmem [shape: f32[1,128], index: 2, kind: input, shape index: {}]   ;;  %s1546_s3 = inlined_call_operand.hbm [shape: bf16[128,128], index: 3, kind: input, shape index: {}]   ;;  %s1547_s4 = inlined_call_operand.vmem [shape: f32[1,128], index: 4, kind: input, shape index: {}]   ;;  %s1548_s5 = inlined_call_operand.hbm [shape: bf16[128,128], index: 5, kind: input, shape index: {}]   ;;  %s1549_s6 = inlined_call_operand.vmem [shape: f32[1,128], index: 6, kind: input, shape index: {}]   ;;  %s1550_s7 = inlined_call_operand.hbm [shape: f32[32,128], index: 7, kind: output, shape index: {}]  }
   0x1   :  { %1557 = sst [smem:[#allocation15_spill]] %s1544_s1 }
   0x2   :  { %12 = vsyncpa [#allocation3], 0 }
   0x3   :  { %14 = vsyncpa [#allocation3 + $0x1], 0 }
   0x4   :  { %15 = vsyncpa [#allocation6], 0 }
   0x5   :  { %16 = vsyncpa [#allocation9], 0 }
   0x6   :  { %17 = vsyncpa [#allocation4], 0 }
   0x7   :  { %19 = vsyncpa [#allocation4 + $0x1], 0  ;;  %s1288_s24 = smov 0   ;;  %s1290_s25 = smov 0  }
   0x8   :  { %s1292_s26 = smov 0   ;;  %s1294_s27 = smov 0  }
   0x9 LB: > { %s1309_s28 = sadd.s32 4294967295, %s1235_s27   ;;  %s812_s29 = sadd.s32 4294967294, %s1235_s27   ;;  %s1235_s27 = sphi %s1294_s27, %s1579_s27   ;;  %s1231_s26 = sphi %s1292_s26, %s1578_s26   ;;  %s1227_s25 = sphi %s1290_s25, %s1577_s25   ;;  %s1223_s24 = sphi %s1288_s24, %s1576_s24  }
   0xa   : > { %p45_p0 = scmp.ne.s32.totalorder %s1227_s25, %s1223_s24  ;;  %p1551_p1 = scmp.eq.s32.totalorder %s1309_s28, 0 }
   0xb   : > { %p195_p2 = scmp.eq.s32.totalorder %s1309_s28, 1  ;;  %p201_p3 = scmp.eq.s32.totalorder %s812_s29, 1 }
   0xc   : > { %p1318_p4 = por %p1551_p1, %p45_p0  ;;  %p813_p5 = scmp.ge.s32.totalorder %s1235_s27, 1 }
   0xd   : > { %p1323_p6 = por %p201_p3, %p45_p0  ;;  %p208_p7 = scmp.lt.s32.totalorder %s1235_s27, 3 }
   0xe   : > { %s1558_s30 = scalar_select %p1318_p4, 1, 0 }
   0xf   : > { %s1559_s8 = scalar_select %p1323_p6, 1, 0 }
  0x10   : > { %p1328_p8 = pnand %p813_p5, %p208_p7  ;;  %s1237_s10 = smov [#allocation5]  }
  0x11   : > { %s220_s11 = sshll.u32 %s1237_s10, 4  ;;  %s1238_s13 = smov [#allocation7]   ;;  %s221_s11 = int_to_ptr.vmem [resolvable:$true] %s220_s11 }
  0x12   : > { %s1560_s9 = scalar_select %p1328_p8, 1, 0 }
  0x13   : > { %p965_p9 = pneg %p1328_p8  ;;  %s236_s14 = sshll.u32 %s1238_s13, 4  ;;  %s237_s14 = int_to_ptr.vmem [resolvable:$true] %s236_s14 }
  0x14   : > { %s1239_s15 = smov [#allocation8]   ;;  %s1068_s17 = scalar_lea.vmem %s221_s11, 1024 }
  0x15   : > { %p1337_p11 = pnand %p965_p9, %p1551_p1  ;;  %s252_s16 = sshll.u32 %s1239_s15, 4  ;;  %s253_s16 = int_to_ptr.vmem [resolvable:$true] %s252_s16 }
  0x16   : > { %p1069_p13 = scmp.ne.s32.totalorder %s221_s11, %s1068_s17  ;;  %p1076_p5 = scmp.lt.s32.totalorder %s221_s11, %s221_s11 }
  0x17   : > { %p1059_p12 = pneg %p1337_p11  ;;  %p1077_p7 = scmp.lt.s32.totalorder %s1068_s17, %s1068_s17 }
  0x19   : > { %p1071_p0 = pnand %p1069_p13, %p1059_p12  ;;  %p1078_p9 = por %p1077_p7, %p1076_p5 }
  0x1b   : > { %p1072_p3 = pneg %p1071_p0 }
  0x1d   : > { %p1079_p10 = pnand %p1078_p9, %p1072_p3 }
  0x1f   : > { %1082 = shalt.err (!%p1079_p10)
}
  0x20   : > { %s1552_s18 = smov 64   ;;  %s1553_s19 = smov 4  }
  0x21   : > { %s1562_s1 = sld [smem:[#allocation15_spill]]  ;;  %s1094_s22 = scalar_lea.vmem %s237_s14, 1024 }
  0x22   : > { %p1095_p13 = scmp.ne.s32.totalorder %s237_s14, %s1094_s22  ;;  %p1102_p3 = scmp.lt.s32.totalorder %s237_s14, %s237_s14 }
  0x23   : > { %p1103_p10 = scmp.lt.s32.totalorder %s1094_s22, %s1094_s22 }
  0x24   : > { %p1097_p0 = pnand %p1095_p13, %p1059_p12 }
  0x25   : > { %p1104_p7 = por %p1103_p10, %p1102_p3 }
  0x26   : > { %p1098_p5 = pneg %p1097_p0 }
  0x27   : > { %968 = dma.hbm_to_vmem [thread:$0]  (!%p1337_p11), %s1562_s1, 1024, %s221_s11, [#allocation6], %s1552_s18, %s1552_s18, %s1553_s19  }
  0x28   : > { %p1105_p9 = pnand %p1104_p7, %p1098_p5 }
  0x2a   : > { %1108 = shalt.err (!%p1105_p9)
}
  0x2b   : > { %971 = dma.hbm_to_vmem [thread:$0]  (!%p1337_p11), %s1546_s3, 1024, %s237_s14, [#allocation6], %s1552_s18, %s1552_s18, %s1553_s19  }
  0x2c   : > { %s1120_s10 = scalar_lea.vmem %s253_s16, 1024  ;;  %p1128_p3 = scmp.lt.s32.totalorder %s253_s16, %s253_s16 }
  0x2d   : > { %p1121_p1 = scmp.ne.s32.totalorder %s253_s16, %s1120_s10  ;;  %p1129_p5 = scmp.lt.s32.totalorder %s1120_s10, %s1120_s10 }
  0x2f   : > { %p1123_p13 = pnand %p1121_p1, %p1059_p12  ;;  %p1130_p10 = por %p1129_p5, %p1128_p3 }
  0x31   : > { %p1124_p0 = pneg %p1123_p13 }
  0x33   : > { %p1131_p7 = pnand %p1130_p10, %p1124_p0 }
  0x35   : > { %1134 = shalt.err (!%p1131_p7)
}
  0x36   : > { %974 = dma.hbm_to_vmem [thread:$0]  (!%p1337_p11), %s1548_s5, 1024, %s253_s16, [#allocation9], %s1552_s18, %s1552_s18, %s1553_s19  }
  0x37   : > { %s1377_s14 = sadd.s32 1, %s1235_s27   ;;  %s32_s15 = sadd.s32 1, %s1231_s26 }
  0x38   : > { %s29_s12 = ssub.s32 %s1235_s27, %s1377_s14  ;;  %p39_p12 = scmp.ne.s32.totalorder %s1231_s26, %s1227_s25 }
  0x39   : > { %p30_p1 = scmp.eq.s32.totalorder %s29_s12, 0  ;;  %p40_p9 = scmp.eq.s32.totalorder %s1235_s27, 0 }
  0x3a   : > { %p986_p13 = scmp.lt.s32.totalorder %s1235_s27, 2  ;;  %p1391_p3 = por %p195_p2, %p39_p12 }
  0x3b   : > { %s1387_s17 = scalar_select %p30_p1, %s1231_s26, %s32_s15  }
  0x3c   : > { %p41_p0 = por %p40_p9, %p39_p12  ;;  %s269_s21 = sand.u32 1, %s1231_s26  }
  0x3d   : > { %s1563_s20 = scalar_select %p1391_p3, 1, 0 }
  0x3e   : > { %s860_s22 = sshll.u32 %s1235_s27, 7  ;;  %s818_s16 = sshll.u32 %s269_s21, 3 }
  0x3f   : > { %s1400_s10 = scalar_lea.hbm %s1543_s0, %s860_s22  ;;  %s273_s11 = scalar_lea.vmem [#allocation2], %s818_s16 }
  0x40   : > { %s280_s13 = sshll.u32 %s273_s11, 4  ;;  %p1402_p11 = pnand %p986_p13, %p41_p0  ;;  %s1406_s13 = int_to_ptr.vmem [resolvable:$true] %s280_s13 }
  0x41   : > { %s1408_s15 = scalar_lea.sflag [#allocation3], %s269_s21  ;;  %s1135_s18 = scalar_lea.hbm %s1400_s10, 128 }
  0x42   : > { %p1136_p2 = scmp.ne.s32.totalorder %s1400_s10, %s1135_s18  ;;  %p1137_p5 = pneg %p1402_p11 }
  0x43   : > { %s1140_s16 = scalar_lea.hbm %s1543_s0, 256  ;;  %p1141_p1 = scmp.lt.s32.totalorder %s1400_s10, %s1543_s0 }
  0x44   : > { %p1138_p10 = pnand %p1137_p5, %p1136_p2  ;;  %p1142_p12 = scmp.lt.s32.totalorder %s1140_s16, %s1135_s18 }
  0x46   : > { %p1139_p7 = pneg %p1138_p10  ;;  %p1143_p9 = por %p1142_p12, %p1141_p1 }
  0x48   : > { %p1144_p13 = pnand %p1143_p9, %p1139_p7 }
  0x4a   : > { %1147 = shalt.err (!%p1144_p13)
}
  0x4b   : > { %s1148_s21 = scalar_lea.vmem %s1406_s13, 128  ;;  %s1242_s19 = smov [#allocation2]  }
  0x4c   : > { %p1149_p0 = scmp.ne.s32.totalorder %s1406_s13, %s1148_s21  ;;  %s1153_s1 = sshll.u32 %s1242_s19, 4  ;;  %s1154_s1 = int_to_ptr.vmem [resolvable:$false] %s1153_s1 }
  0x4d   : > { %s1155_s22 = scalar_lea.vmem %s1154_s1, 256  ;;  %p1156_p10 = scmp.lt.s32.totalorder %s1406_s13, %s1154_s1 }
  0x4e   : > { %p1151_p6 = pnand %p1149_p0, %p1137_p5  ;;  %p1157_p3 = scmp.lt.s32.totalorder %s1155_s22, %s1148_s21 }
  0x50   : > { %p1152_p2 = pneg %p1151_p6  ;;  %p1158_p4 = por %p1157_p3, %p1156_p10 }
  0x52   : > { %p1159_p8 = pnand %p1158_p4, %p1152_p2 }
  0x54   : > { %1162 = shalt.err (!%p1159_p8)
}
  0x55   : > { %s1565_s18 = smov 4   ;;  %s1566_s23 = smov 64  }
  0x56   : > { %978 = dma.hbm_to_vmem [thread:$0]  (!%p1402_p11), %s1400_s10, 128, %s1406_s13, %s1408_s15, %s1566_s23, %s1566_s23, %s1565_s18  }
  0x57   : > { %p1567_p6 = scmp.ne.s32.totalorder %s1560_s9, 0 }
  0x58   : > { %s1435_s19 = sand.u32 (!%p1567_p6), 1, %s1227_s25   ;;  %p1568_p4 = scmp.ne.s32.totalorder (!%p1567_p6), %s1558_s30, 0 }
  0x59   : > { %292 = sbr.rel (%p1567_p6) target bundleno = 755 (0x2f3), region = 48  ;;  %s822_s1 = sshll.u32 (!%p1567_p6), %s1435_s19, 3 }
  0x5a   : > { %s295_s16 = scalar_lea.sflag (!%p1567_p6), [#allocation3], %s1435_s19  ;;  %s1439_s29 = scalar_lea.vmem (!%p1567_p6), [#allocation2], %s822_s1 }
  0x5e   : > { %1206 = dma.done.wait (%p1568_p4), %s295_s16, 128  }
  0x5f   : > { %1208 = vsyncadd (%p1568_p4), %s295_s16, 4294967168  ;;  %p1569_p8 = scmp.eq.s32.totalorder %s1309_s28, 0 }
  0x61   : > { %1210 = dma.done.wait (%p1569_p8), [#allocation6], 2048   ;;  %p1570_p3 = pmov %p1569_p8 }
  0x63   : > { %1212 = vsyncadd (%p1570_p3), [#allocation6], 4294965248  ;;  %p1571_p11 = pmov %p1570_p3 }
  0x64   : > { %p1572_p5 = pmov %p1570_p3 }
  0x65   : > { %1214 = dma.done.wait (%p1571_p11), [#allocation9], 1024  }
  0x66   : > { %1216 = vsyncadd (%p1572_p5), [#allocation9], 4294966272  ;;  %v1243_v0 = vmov 0.0   ;;  %vm1244_vm0 = vmmov 0   ;;  %v1032_v1 = vld [vmem:[#allocation5 + $0x38] sm:$0xff]   ;;  %v1033_v2 = vld [vmem:[#allocation5 + $0x30] sm:$0xff]  }
  0x67   : > { %889 = vmatprep.subr.bf16.mxu0 %v1243_v0  ;;  %905 = vmatprep.mubr.msk.bf16.mxu0 %vm1244_vm0, %v1243_v0  ;;  %v1034_v3 = vld [vmem:[#allocation5 + $0x28] sm:$0xff]   ;;  %v1041_v4 = vld [vmem:[#allocation7 + $0x38] sm:$0xff]   ;;  %v1035_v5 = vld [vmem:[#allocation5 + $0x20] sm:$0xff]   ;;  %s826_s12 = sshll.u32 %s1435_s19, 4  ;;  %s861_s18 = sshll.u32 %s1309_s28, 8 }
  0x68   : > { %909 = vmatprep.subr.bf16.mxu1 %v1243_v0  ;;  %925 = vmatprep.mubr.msk.bf16.mxu1 %vm1244_vm0, %v1243_v0  ;;  %v1042_v6 = vld [vmem:[#allocation7 + $0x30] sm:$0xff]   ;;  %v1036_v7 = vld [vmem:[#allocation5 + $0x18] sm:$0xff]   ;;  %v1043_v8 = vld [vmem:[#allocation7 + $0x28] sm:$0xff]   ;;  %s340_s21 = scalar_lea.vmem [#allocation10], %s826_s12  ;;  %s1500_s16 = scalar_lea.hbm %s1550_s7, %s861_s18 }
  0x69   : > { %890 = vmatpush3.bf16.msra.mxu0 %v1032_v1  ;;  %910 = vmatpush3.bf16.msra.mxu1 %v1041_v4  ;;  %v1037_v9 = vld [vmem:[#allocation5 + $0x10] sm:$0xff]   ;;  %v1044_v10 = vld [vmem:[#allocation7 + $0x20] sm:$0xff]   ;;  %v1038_v11 = vld [vmem:[#allocation5 + $0x8] sm:$0xff]   ;;  %s710_s22 = sshll.u32 %s340_s21, 4  ;;  %p1573_p1 = scmp.ne.s32.totalorder %s1563_s20, 0  ;;  %s1495_s22 = int_to_ptr.vmem [resolvable:$true] %s710_s22 }
  0x6a   : > { %891 = vmatprep.subr.bf16.mxu0 %v1243_v0  ;;  %911 = vmatprep.subr.bf16.mxu1 %v1243_v0  ;;  %v1045_v12 = vld [vmem:[#allocation7 + $0x18] sm:$0xff]   ;;  %v1039_v13 = vld [vmem:[#allocation5] sm:$0xff]   ;;  %v1046_v15 = vld [vmem:[#allocation7 + $0x10] sm:$0xff]   ;;  %s1163_s30 = scalar_lea.vmem %s1495_s22, 256  ;;  %s1245_s28 = smov [#allocation10]  }
  0x6b   : > { %v1040_v14 = vld [vmem:[%s1439_s29] sm:$0xff]   ;;  %v1047_v16 = vld [vmem:[#allocation7 + $0x8] sm:$0xff]   ;;  %v1048_v17 = vld [vmem:[#allocation7] sm:$0xff]   ;;  %s697_s29 = scalar_lea.sflag [#allocation4], %s1435_s19  ;;  %p1164_p7 = scmp.ne.s32.totalorder %s1495_s22, %s1163_s30 }
  0x6c   : > { %v1049_v18 = vld [vmem:[#allocation8 + $0x38] sm:$0xff]   ;;  %v1050_v19 = vld [vmem:[#allocation8 + $0x30] sm:$0xff]   ;;  %v1051_v20 = vld [vmem:[#allocation8 + $0x28] sm:$0xff]   ;;  %s1167_s9 = sshll.u32 %s1245_s28, 4  ;;  %s1168_s9 = int_to_ptr.vmem [resolvable:$false] %s1167_s9 }
  0x6d   : > { %892 = vmatpush3.bf16.msra.mxu0 %v1033_v2  ;;  %912 = vmatpush3.bf16.msra.mxu1 %v1042_v6  ;;  %v1052_v21 = vld [vmem:[#allocation8 + $0x20] sm:$0xff]   ;;  %v1053_v22 = vld [vmem:[#allocation8 + $0x18] sm:$0xff]   ;;  %v827_v23 = vld [vmem:[%s1545_s2] ss:$0 sm:$0xff]  ;;  %p1165_p12 = pnand %p1164_p7, %p1573_p1  ;;  %s1169_s10 = scalar_lea.vmem %s1168_s9, 512 }
  0x6e   : > { %893 = vmatprep.subr.bf16.mxu0 %v1243_v0  ;;  %913 = vmatprep.subr.bf16.mxu1 %v1243_v0  ;;  %v1054_v33 = vld [vmem:[#allocation8 + $0x10] sm:$0xff]   ;;  %v1055_v34 = vld [vmem:[#allocation8 + $0x8] sm:$0xff]   ;;  %v1056_v35 = vld [vmem:[#allocation8] sm:$0xff]   ;;  %p1170_p13 = scmp.lt.s32.totalorder %s1495_s22, %s1168_s9  ;;  %p1171_p0 = scmp.lt.s32.totalorder %s1169_s10, %s1163_s30 }
  0x6f   : > { %v837_v36 = vld [vmem:[%s1547_s4] ss:$0 sm:$0xff]  ;;  %p1166_p9 = pneg %p1165_p12 }
  0x70   : > { %v846_v46 = vld [vmem:[%s1549_s6] ss:$0 sm:$0xff]  ;;  %p1172_p2 = por %p1171_p0, %p1170_p13 }
  0x71   : > { %894 = vmatpush3.bf16.msra.mxu0 %v1034_v3  ;;  %914 = vmatpush3.bf16.msra.mxu1 %v1043_v8 }
  0x72   : > { %895 = vmatprep.subr.bf16.mxu0 %v1243_v0  ;;  %915 = vmatprep.subr.bf16.mxu1 %v1243_v0  ;;  %p1173_p10 = pnand %p1172_p2, %p1166_p9 }
  0x75   : > { %896 = vmatpush3.bf16.msra.mxu0 %v1035_v5  ;;  %916 = vmatpush3.bf16.msra.mxu1 %v1044_v10 }
  0x76   : > { %897 = vmatprep.subr.bf16.mxu0 %v1243_v0  ;;  %917 = vmatprep.subr.bf16.mxu1 %v1243_v0 }
  0x79   : > { %898 = vmatpush3.bf16.msra.mxu0 %v1036_v7  ;;  %918 = vmatpush3.bf16.msra.mxu1 %v1045_v12 }
  0x7a   : > { %899 = vmatprep.subr.bf16.mxu0 %v1243_v0  ;;  %919 = vmatprep.subr.bf16.mxu1 %v1243_v0 }
  0x7d   : > { %900 = vmatpush3.bf16.msra.mxu0 %v1037_v9  ;;  %920 = vmatpush3.bf16.msra.mxu1 %v1046_v15 }
  0x7e   : > { %901 = vmatprep.subr.bf16.mxu0 %v1243_v0  ;;  %921 = vmatprep.subr.bf16.mxu1 %v1243_v0 }
  0x81   : > { %902 = vmatpush3.bf16.msra.mxu0 %v1038_v11  ;;  %922 = vmatpush3.bf16.msra.mxu1 %v1047_v16 }
  0x82   : > { %903 = vmatprep.subr.bf16.mxu0 %v1243_v0  ;;  %923 = vmatprep.subr.bf16.mxu1 %v1243_v0 }
  0x85   : > { %904 = vmatpush3.bf16.msra.mxu0 %v1039_v13  ;;  %924 = vmatpush3.bf16.msra.mxu1 %v1048_v17 }
  0x86   : > { %929 = vmatprep.subr.bf16.mxu0 %v1243_v0 }
  0x88   : > { %906 = vmatmul.mubr.bf16.vlgmr.msra.gmra.mxu0 %v1040_v14 }
  0x89   : > { %945 = vmatprep.mubr.msk.bf16.mxu0 %vm1244_vm0, %v1243_v0  ;;  %930 = vmatpush3.bf16.msra.mxu0 %v1049_v18 }
  0x8a   : > { %931 = vmatprep.subr.bf16.mxu0 %v1243_v0 }
  0x8d   : > { %932 = vmatpush3.bf16.msra.mxu0 %v1050_v19 }
  0x8e   : > { %933 = vmatprep.subr.bf16.mxu0 %v1243_v0 }
  0x91   : > { %934 = vmatpush3.bf16.msra.mxu0 %v1051_v20 }
  0x92   : > { %935 = vmatprep.subr.bf16.mxu0 %v1243_v0 }
  0x95   : > { %936 = vmatpush3.bf16.msra.mxu0 %v1052_v21 }
  0x96   : > { %937 = vmatprep.subr.bf16.mxu0 %v1243_v0 }
  0x99   : > { %938 = vmatpush3.bf16.msra.mxu0 %v1053_v22 }
  0x9a   : > { %939 = vmatprep.subr.bf16.mxu0 %v1243_v0 }
  0x9d   : > { %940 = vmatpush3.bf16.msra.mxu0 %v1054_v33 }
  0x9e   : > { %941 = vmatprep.subr.bf16.mxu0 %v1243_v0 }
  0xa1   : > { %942 = vmatpush3.bf16.msra.mxu0 %v1055_v34 }
  0xa2   : > { %943 = vmatprep.subr.bf16.mxu0 %v1243_v0 }
  0xa5   : > { %944 = vmatpush3.bf16.msra.mxu0 %v1056_v35 }
 0x148   : > { %v457_v24 = vpop.f32.mrf.mxu0 }
 0x149   : > { %v458_v26 = vadd.f32 %v827_v23, %v457_v24 }
 0x14a   : > { %v907_v25 = vpop.f32.mrf.mxu0 }
 0x14b   : > { %v464_v30 = vmax.f32 %v458_v26, 0.0 }
 0x14c   : > { %v460_v27 = vpop.f32.mrf.mxu0 }
 0x14d   : > { %v461_v28 = vadd.f32 %v827_v23, %v460_v27 }
 0x14e   : > { %v908_v29 = vpop.f32.mrf.mxu0 }
 0x14f   : > { %v465_v31 = vmax.f32 %v461_v28, 0.0 }
 0x151   : > { %v466_v32 = vpack.c.bf16 %v465_v31, %v464_v30 }
 0x153   : > { %926 = vmatmul.mubr.bf16.vlgmr.msra.gmra.mxu1 %v466_v32 }
 0x213   : > { %v572_v37 = vpop.f32.mrf.mxu1 }
 0x214   : > { %v573_v39 = vadd.f32 %v837_v36, %v572_v37 }
 0x215   : > { %v927_v38 = vpop.f32.mrf.mxu1 }
 0x216   : > { %v579_v43 = vmax.f32 %v573_v39, 0.0 }
 0x217   : > { %v575_v40 = vpop.f32.mrf.mxu1 }
 0x218   : > { %v576_v41 = vadd.f32 %v837_v36, %v575_v40 }
 0x219   : > { %v928_v42 = vpop.f32.mrf.mxu1 }
 0x21a   : > { %v580_v44 = vmax.f32 %v576_v41, 0.0 }
 0x21c   : > { %v581_v45 = vpack.c.bf16 %v580_v44, %v579_v43 }
 0x21e   : > { %946 = vmatmul.mubr.bf16.vlgmr.msra.gmra.mxu0 %v581_v45 }
 0x2de   : > { %v687_v47 = vpop.f32.mrf.mxu0 }
 0x2df   : > { %v688_v48 = vadd.f32 %v846_v46, %v687_v47 }
 0x2e0   : > { %v947_v49 = vpop.f32.mrf.mxu0 }
 0x2e1   : > { %694 = vst [vmem:[%s340_s21] sm:$0xff] %v688_v48 }
 0x2e2   : > { %v690_v50 = vpop.f32.mrf.mxu0 }
 0x2e3   : > { %v691_v51 = vadd.f32 %v846_v46, %v690_v50 }
 0x2e4   : > { %v948_v52 = vpop.f32.mrf.mxu0 }
 0x2e5   : > { %695 = vst [vmem:[%s340_s21 + $0x8] sm:$0xff] %v691_v51 }
 0x2e6   : > { %1176 = shalt.err (!%p1173_p10)
}
 0x2e7   : > { %s1177_s13 = scalar_lea.hbm %s1500_s16, 256  ;;  %s1181_s11 = scalar_lea.hbm %s1550_s7, 512 }
 0x2e8   : > { %p1178_p6 = scmp.ne.s32.totalorder %s1500_s16, %s1177_s13  ;;  %p1182_p3 = scmp.lt.s32.totalorder %s1500_s16, %s1550_s7 }
 0x2e9   : > { %p1183_p11 = scmp.lt.s32.totalorder %s1181_s11, %s1177_s13 }
 0x2ea   : > { %p1179_p4 = pnand %p1178_p6, %p1573_p1 }
 0x2eb   : > { %p1184_p5 = por %p1183_p11, %p1182_p3 }
 0x2ec   : > { %p1180_p8 = pneg %p1179_p4 }
 0x2ee   : > { %p1185_p7 = pnand %p1184_p5, %p1180_p8 }
 0x2f0   : > { %1188 = shalt.err (!%p1185_p7)
}
 0x2f1   : > { %s1246_s23 = smov 128   ;;  %s1247_s1 = smov 8  }
 0x2f2   : > { %963 = dma.vmem_to_hbm [thread:$0]  (%p1573_p1), %s1495_s22, 256, %s1500_s16, %s697_s29, %s1246_s23, %s1246_s23, %s1247_s1  }
 0x2f3 PF: > { %s725_s30 = sand.u32 1, %s1223_s24   ;;  %p1574_p12 = scmp.ne.s32.totalorder %s1559_s8, 0 }
 0x2f4   : > { %p1575_p9 = scmp.ge.s32.totalorder %s1235_s27, 2  ;;  %s726_s28 = scalar_lea.sflag [#allocation4], %s725_s30 }
 0x2f6   : > { %p980_p13 = pnand %p1575_p9, %p1574_p12 }
 0x2f8   : > { %p981_p0 = pneg %p980_p13 }
 0x2fa   : > { %1218 = dma.done.wait (%p981_p0), %s726_s28, 256  }
 0x2fb   : > { %1220 = vsyncadd (%p981_p0), %s726_s28, 4294967040  ;;  %p22_p2 = scmp.ge.s32.totalorder %s1377_s14, 4   ;;  %s1576_s24 = smov %s1227_s25 }
 0x2fc   : > { %s1577_s25 = smov %s1231_s26  ;;  %s1578_s26 = smov %s1387_s17 }
 0x2fd   : > { %s1579_s27 = smov %s1377_s14  ;;  %24 = sbr.rel (!%p22_p2) target bundleno = 9 (0x9), region = 105 }
 0x302   :  { %731 = vsyncpa [#allocation3], 1 }
 0x303   :  { %733 = vsyncpa [#allocation3 + $0x1], 1 }
 0x304   :  { %734 = vsyncpa [#allocation6], 1 }
 0x305   :  { %735 = vsyncpa [#allocation9], 1 }
 0x306   :  { %736 = vsyncpa [#allocation4], 1 }
 0x307   :  { %738 = vsyncpa [#allocation4 + $0x1], 1 }

// kernel: tpu_custom_call.1
= control target key start
LH: loop header
LB: loop body
LE: loop exit
PB: predicated region body
PF: predicated region fallthrough
CT: control target
= control target key end

     0   :  { %s1543_s0 = inlined_call_operand.hbm [shape: bf16[32,128], index: 0, kind: input, shape index: {}]   ;;  %s1544_s1 = inlined_call_operand.hbm [shape: bf16[128,128], index: 1, kind: input, shape index: {}]   ;;  %s1545_s2 = inlined_call_operand.vmem [shape: f32[1,128], index: 2, kind: input, shape index: {}]   ;;  %s1546_s3 = inlined_call_operand.hbm [shape: bf16[128,128], index: 3, kind: input, shape index: {}]   ;;  %s1547_s4 = inlined_call_operand.vmem [shape: f32[1,128], index: 4, kind: input, shape index: {}]   ;;  %s1548_s5 = inlined_call_operand.hbm [shape: bf16[128,128], index: 5, kind: input, shape index: {}]   ;;  %s1549_s6 = inlined_call_operand.vmem [shape: f32[1,128], index: 6, kind: input, shape index: {}]   ;;  %s1550_s7 = inlined_call_operand.hbm [shape: f32[32,128], index: 7, kind: output, shape index: {}]  }
   0x1   :  { %1557 = sst [smem:[#allocation15_spill]] %s1544_s1 }
   0x2   :  { %12 = vsyncpa [#allocation3], 0 }
   0x3   :  { %14 = vsyncpa [#allocation3 + $0x1], 0 }
   0x4   :  { %15 = vsyncpa [#allocation6], 0 }
   0x5   :  { %16 = vsyncpa [#allocation9], 0 }
   0x6   :  { %17 = vsyncpa [#allocation4], 0 }
   0x7   :  { %19 = vsyncpa [#allocation4 + $0x1], 0  ;;  %s1288_s24 = smov 0   ;;  %s1290_s25 = smov 0  }
   0x8   :  { %s1292_s26 = smov 0   ;;  %s1294_s27 = smov 0  }
   0x9 LB: > { %s1309_s28 = sadd.s32 4294967295, %s1235_s27   ;;  %s812_s29 = sadd.s32 4294967294, %s1235_s27   ;;  %s1235_s27 = sphi %s1294_s27, %s1579_s27   ;;  %s1231_s26 = sphi %s1292_s26, %s1578_s26   ;;  %s1227_s25 = sphi %s1290_s25, %s1577_s25   ;;  %s1223_s24 = sphi %s1288_s24, %s1576_s24  }
   0xa   : > { %p45_p0 = scmp.ne.s32.totalorder %s1227_s25, %s1223_s24  ;;  %p1551_p1 = scmp.eq.s32.totalorder %s1309_s28, 0 }
   0xb   : > { %p195_p2 = scmp.eq.s32.totalorder %s1309_s28, 1  ;;  %p201_p3 = scmp.eq.s32.totalorder %s812_s29, 1 }
   0xc   : > { %p1318_p4 = por %p1551_p1, %p45_p0  ;;  %p813_p5 = scmp.ge.s32.totalorder %s1235_s27, 1 }
   0xd   : > { %p1323_p6 = por %p201_p3, %p45_p0  ;;  %p208_p7 = scmp.lt.s32.totalorder %s1235_s27, 3 }
   0xe   : > { %s1558_s30 = scalar_select %p1318_p4, 1, 0 }
   0xf   : > { %s1559_s8 = scalar_select %p1323_p6, 1, 0 }
  0x10   : > { %p1328_p8 = pnand %p813_p5, %p208_p7  ;;  %s1237_s10 = smov [#allocation5]  }
  0x11   : > { %s220_s11 = sshll.u32 %s1237_s10, 4  ;;  %s1238_s13 = smov [#allocation7]   ;;  %s221_s11 = int_to_ptr.vmem [resolvable:$true] %s220_s11 }
  0x12   : > { %s1560_s9 = scalar_select %p1328_p8, 1, 0 }
  0x13   : > { %p965_p9 = pneg %p1328_p8  ;;  %s236_s14 = sshll.u32 %s1238_s13, 4  ;;  %s237_s14 = int_to_ptr.vmem [resolvable:$true] %s236_s14 }
  0x14   : > { %s1239_s15 = smov [#allocation8]   ;;  %s1068_s17 = scalar_lea.vmem %s221_s11, 1024 }
  0x15   : > { %p1337_p11 = pnand %p965_p9, %p1551_p1  ;;  %s252_s16 = sshll.u32 %s1239_s15, 4  ;;  %s253_s16 = int_to_ptr.vmem [resolvable:$true] %s252_s16 }
  0x16   : > { %p1069_p13 = scmp.ne.s32.totalorder %s221_s11, %s1068_s17  ;;  %p1076_p5 = scmp.lt.s32.totalorder %s221_s11, %s221_s11 }
  0x17   : > { %p1059_p12 = pneg %p1337_p11  ;;  %p1077_p7 = scmp.lt.s32.totalorder %s1068_s17, %s1068_s17 }
  0x19   : > { %p1071_p0 = pnand %p1069_p13, %p1059_p12  ;;  %p1078_p9 = por %p1077_p7, %p1076_p5 }
  0x1b   : > { %p1072_p3 = pneg %p1071_p0 }
  0x1d   : > { %p1079_p10 = pnand %p1078_p9, %p1072_p3 }
  0x1f   : > { %1082 = shalt.err (!%p1079_p10)
}
  0x20   : > { %s1552_s18 = smov 64   ;;  %s1553_s19 = smov 4  }
  0x21   : > { %s1562_s1 = sld [smem:[#allocation15_spill]]  ;;  %s1094_s22 = scalar_lea.vmem %s237_s14, 1024 }
  0x22   : > { %p1095_p13 = scmp.ne.s32.totalorder %s237_s14, %s1094_s22  ;;  %p1102_p3 = scmp.lt.s32.totalorder %s237_s14, %s237_s14 }
  0x23   : > { %p1103_p10 = scmp.lt.s32.totalorder %s1094_s22, %s1094_s22 }
  0x24   : > { %p1097_p0 = pnand %p1095_p13, %p1059_p12 }
  0x25   : > { %p1104_p7 = por %p1103_p10, %p1102_p3 }
  0x26   : > { %p1098_p5 = pneg %p1097_p0 }
  0x27   : > { %968 = dma.hbm_to_vmem [thread:$0]  (!%p1337_p11), %s1562_s1, 1024, %s221_s11, [#allocation6], %s1552_s18, %s1552_s18, %s1553_s19  }
  0x28   : > { %p1105_p9 = pnand %p1104_p7, %p1098_p5 }
  0x2a   : > { %1108 = shalt.err (!%p1105_p9)
}
  0x2b   : > { %971 = dma.hbm_to_vmem [thread:$0]  (!%p1337_p11), %s1546_s3, 1024, %s237_s14, [#allocation6], %s1552_s18, %s1552_s18, %s1553_s19  }
  0x2c   : > { %s1120_s10 = scalar_lea.vmem %s253_s16, 1024  ;;  %p1128_p3 = scmp.lt.s32.totalorder %s253_s16, %s253_s16 }
  0x2d   : > { %p1121_p1 = scmp.ne.s32.totalorder %s253_s16, %s1120_s10  ;;  %p1129_p5 = scmp.lt.s32.totalorder %s1120_s10, %s1120_s10 }
  0x2f   : > { %p1123_p13 = pnand %p1121_p1, %p1059_p12  ;;  %p1130_p10 = por %p1129_p5, %p1128_p3 }
  0x31   : > { %p1124_p0 = pneg %p1123_p13 }
  0x33   : > { %p1131_p7 = pnand %p1130_p10, %p1124_p0 }
  0x35   : > { %1134 = shalt.err (!%p1131_p7)
}
  0x36   : > { %974 = dma.hbm_to_vmem [thread:$0]  (!%p1337_p11), %s1548_s5, 1024, %s253_s16, [#allocation9], %s1552_s18, %s1552_s18, %s1553_s19  }
  0x37   : > { %s1377_s14 = sadd.s32 1, %s1235_s27   ;;  %s32_s15 = sadd.s32 1, %s1231_s26 }
  0x38   : > { %s29_s12 = ssub.s32 %s1235_s27, %s1377_s14  ;;  %p39_p12 = scmp.ne.s32.totalorder %s1231_s26, %s1227_s25 }
  0x39   : > { %p30_p1 = scmp.eq.s32.totalorder %s29_s12, 0  ;;  %p40_p9 = scmp.eq.s32.totalorder %s1235_s27, 0 }
  0x3a   : > { %p986_p13 = scmp.lt.s32.totalorder %s1235_s27, 2  ;;  %p1391_p3 = por %p195_p2, %p39_p12 }
  0x3b   : > { %s1387_s17 = scalar_select %p30_p1, %s1231_s26, %s32_s15  }
  0x3c   : > { %p41_p0 = por %p40_p9, %p39_p12  ;;  %s269_s21 = sand.u32 1, %s1231_s26  }
  0x3d   : > { %s1563_s20 = scalar_select %p1391_p3, 1, 0 }
  0x3e   : > { %s860_s22 = sshll.u32 %s1235_s27, 7  ;;  %s818_s16 = sshll.u32 %s269_s21, 3 }
  0x3f   : > { %s1400_s10 = scalar_lea.hbm %s1543_s0, %s860_s22  ;;  %s273_s11 = scalar_lea.vmem [#allocation2], %s818_s16 }
  0x40   : > { %s280_s13 = sshll.u32 %s273_s11, 4  ;;  %p1402_p11 = pnand %p986_p13, %p41_p0  ;;  %s1406_s13 = int_to_ptr.vmem [resolvable:$true] %s280_s13 }
  0x41   : > { %s1408_s15 = scalar_lea.sflag [#allocation3], %s269_s21  ;;  %s1135_s18 = scalar_lea.hbm %s1400_s10, 128 }
  0x42   : > { %p1136_p2 = scmp.ne.s32.totalorder %s1400_s10, %s1135_s18  ;;  %p1137_p5 = pneg %p1402_p11 }
  0x43   : > { %s1140_s16 = scalar_lea.hbm %s1543_s0, 256  ;;  %p1141_p1 = scmp.lt.s32.totalorder %s1400_s10, %s1543_s0 }
  0x44   : > { %p1138_p10 = pnand %p1137_p5, %p1136_p2  ;;  %p1142_p12 = scmp.lt.s32.totalorder %s1140_s16, %s1135_s18 }
  0x46   : > { %p1139_p7 = pneg %p1138_p10  ;;  %p1143_p9 = por %p1142_p12, %p1141_p1 }
  0x48   : > { %p1144_p13 = pnand %p1143_p9, %p1139_p7 }
  0x4a   : > { %1147 = shalt.err (!%p1144_p13)
}
  0x4b   : > { %s1148_s21 = scalar_lea.vmem %s1406_s13, 128  ;;  %s1242_s19 = smov [#allocation2]  }
  0x4c   : > { %p1149_p0 = scmp.ne.s32.totalorder %s1406_s13, %s1148_s21  ;;  %s1153_s1 = sshll.u32 %s1242_s19, 4  ;;  %s1154_s1 = int_to_ptr.vmem [resolvable:$false] %s1153_s1 }
  0x4d   : > { %s1155_s22 = scalar_lea.vmem %s1154_s1, 256  ;;  %p1156_p10 = scmp.lt.s32.totalorder %s1406_s13, %s1154_s1 }
  0x4e   : > { %p1151_p6 = pnand %p1149_p0, %p1137_p5  ;;  %p1157_p3 = scmp.lt.s32.totalorder %s1155_s22, %s1148_s21 }
  0x50   : > { %p1152_p2 = pneg %p1151_p6  ;;  %p1158_p4 = por %p1157_p3, %p1156_p10 }
  0x52   : > { %p1159_p8 = pnand %p1158_p4, %p1152_p2 }
  0x54   : > { %1162 = shalt.err (!%p1159_p8)
}
  0x55   : > { %s1565_s18 = smov 4   ;;  %s1566_s23 = smov 64  }
  0x56   : > { %978 = dma.hbm_to_vmem [thread:$0]  (!%p1402_p11), %s1400_s10, 128, %s1406_s13, %s1408_s15, %s1566_s23, %s1566_s23, %s1565_s18  }
  0x57   : > { %p1567_p6 = scmp.ne.s32.totalorder %s1560_s9, 0 }
  0x58   : > { %s1435_s19 = sand.u32 (!%p1567_p6), 1, %s1227_s25   ;;  %p1568_p4 = scmp.ne.s32.totalorder (!%p1567_p6), %s1558_s30, 0 }
  0x59   : > { %292 = sbr.rel (%p1567_p6) target bundleno = 755 (0x2f3), region = 48  ;;  %s822_s1 = sshll.u32 (!%p1567_p6), %s1435_s19, 3 }
  0x5a   : > { %s295_s16 = scalar_lea.sflag (!%p1567_p6), [#allocation3], %s1435_s19  ;;  %s1439_s29 = scalar_lea.vmem (!%p1567_p6), [#allocation2], %s822_s1 }
  0x5e   : > { %1206 = dma.done.wait (%p1568_p4), %s295_s16, 128  }
  0x5f   : > { %1208 = vsyncadd (%p1568_p4), %s295_s16, 4294967168  ;;  %p1569_p8 = scmp.eq.s32.totalorder %s1309_s28, 0 }
  0x61   : > { %1210 = dma.done.wait (%p1569_p8), [#allocation6], 2048   ;;  %p1570_p3 = pmov %p1569_p8 }
  0x63   : > { %1212 = vsyncadd (%p1570_p3), [#allocation6], 4294965248  ;;  %p1571_p11 = pmov %p1570_p3 }
  0x64   : > { %p1572_p5 = pmov %p1570_p3 }
  0x65   : > { %1214 = dma.done.wait (%p1571_p11), [#allocation9], 1024  }
  0x66   : > { %1216 = vsyncadd (%p1572_p5), [#allocation9], 4294966272  ;;  %v1243_v0 = vmov 0.0   ;;  %vm1244_vm0 = vmmov 0   ;;  %v1032_v1 = vld [vmem:[#allocation5 + $0x38] sm:$0xff]   ;;  %v1033_v2 = vld [vmem:[#allocation5 + $0x30] sm:$0xff]  }
  0x67   : > { %889 = vmatprep.subr.bf16.mxu0 %v1243_v0  ;;  %905 = vmatprep.mubr.msk.bf16.mxu0 %vm1244_vm0, %v1243_v0  ;;  %v1034_v3 = vld [vmem:[#allocation5 + $0x28] sm:$0xff]   ;;  %v1041_v4 = vld [vmem:[#allocation7 + $0x38] sm:$0xff]   ;;  %v1035_v5 = vld [vmem:[#allocation5 + $0x20] sm:$0xff]   ;;  %s826_s12 = sshll.u32 %s1435_s19, 4  ;;  %s861_s18 = sshll.u32 %s1309_s28, 8 }
  0x68   : > { %909 = vmatprep.subr.bf16.mxu1 %v1243_v0  ;;  %925 = vmatprep.mubr.msk.bf16.mxu1 %vm1244_vm0, %v1243_v0  ;;  %v1042_v6 = vld [vmem:[#allocation7 + $0x30] sm:$0xff]   ;;  %v1036_v7 = vld [vmem:[#allocation5 + $0x18] sm:$0xff]   ;;  %v1043_v8 = vld [vmem:[#allocation7 + $0x28] sm:$0xff]   ;;  %s340_s21 = scalar_lea.vmem [#allocation10], %s826_s12  ;;  %s1500_s16 = scalar_lea.hbm %s1550_s7, %s861_s18 }
  0x69   : > { %890 = vmatpush3.bf16.msra.mxu0 %v1032_v1  ;;  %910 = vmatpush3.bf16.msra.mxu1 %v1041_v4  ;;  %v1037_v9 = vld [vmem:[#allocation5 + $0x10] sm:$0xff]   ;;  %v1044_v10 = vld [vmem:[#allocation7 + $0x20] sm:$0xff]   ;;  %v1038_v11 = vld [vmem:[#allocation5 + $0x8] sm:$0xff]   ;;  %s710_s22 = sshll.u32 %s340_s21, 4  ;;  %p1573_p1 = scmp.ne.s32.totalorder %s1563_s20, 0  ;;  %s1495_s22 = int_to_ptr.vmem [resolvable:$true] %s710_s22 }
  0x6a   : > { %891 = vmatprep.subr.bf16.mxu0 %v1243_v0  ;;  %911 = vmatprep.subr.bf16.mxu1 %v1243_v0  ;;  %v1045_v12 = vld [vmem:[#allocation7 + $0x18] sm:$0xff]   ;;  %v1039_v13 = vld [vmem:[#allocation5] sm:$0xff]   ;;  %v1046_v15 = vld [vmem:[#allocation7 + $0x10] sm:$0xff]   ;;  %s1163_s30 = scalar_lea.vmem %s1495_s22, 256  ;;  %s1245_s28 = smov [#allocation10]  }
  0x6b   : > { %v1040_v14 = vld [vmem:[%s1439_s29] sm:$0xff]   ;;  %v1047_v16 = vld [vmem:[#allocation7 + $0x8] sm:$0xff]   ;;  %v1048_v17 = vld [vmem:[#allocation7] sm:$0xff]   ;;  %s697_s29 = scalar_lea.sflag [#allocation4], %s1435_s19  ;;  %p1164_p7 = scmp.ne.s32.totalorder %s1495_s22, %s1163_s30 }
  0x6c   : > { %v1049_v18 = vld [vmem:[#allocation8 + $0x38] sm:$0xff]   ;;  %v1050_v19 = vld [vmem:[#allocation8 + $0x30] sm:$0xff]   ;;  %v1051_v20 = vld [vmem:[#allocation8 + $0x28] sm:$0xff]   ;;  %s1167_s9 = sshll.u32 %s1245_s28, 4  ;;  %s1168_s9 = int_to_ptr.vmem [resolvable:$false] %s1167_s9 }
  0x6d   : > { %892 = vmatpush3.bf16.msra.mxu0 %v1033_v2  ;;  %912 = vmatpush3.bf16.msra.mxu1 %v1042_v6  ;;  %v1052_v21 = vld [vmem:[#allocation8 + $0x20] sm:$0xff]   ;;  %v1053_v22 = vld [vmem:[#allocation8 + $0x18] sm:$0xff]   ;;  %v827_v23 = vld [vmem:[%s1545_s2] ss:$0 sm:$0xff]  ;;  %p1165_p12 = pnand %p1164_p7, %p1573_p1  ;;  %s1169_s10 = scalar_lea.vmem %s1168_s9, 512 }
  0x6e   : > { %893 = vmatprep.subr.bf16.mxu0 %v1243_v0  ;;  %913 = vmatprep.subr.bf16.mxu1 %v1243_v0  ;;  %v1054_v33 = vld [vmem:[#allocation8 + $0x10] sm:$0xff]   ;;  %v1055_v34 = vld [vmem:[#allocation8 + $0x8] sm:$0xff]   ;;  %v1056_v35 = vld [vmem:[#allocation8] sm:$0xff]   ;;  %p1170_p13 = scmp.lt.s32.totalorder %s1495_s22, %s1168_s9  ;;  %p1171_p0 = scmp.lt.s32.totalorder %s1169_s10, %s1163_s30 }
  0x6f   : > { %v837_v36 = vld [vmem:[%s1547_s4] ss:$0 sm:$0xff]  ;;  %p1166_p9 = pneg %p1165_p12 }
  0x70   : > { %v846_v46 = vld [vmem:[%s1549_s6] ss:$0 sm:$0xff]  ;;  %p1172_p2 = por %p1171_p0, %p1170_p13 }
  0x71   : > { %894 = vmatpush3.bf16.msra.mxu0 %v1034_v3  ;;  %914 = vmatpush3.bf16.msra.mxu1 %v1043_v8 }
  0x72   : > { %895 = vmatprep.subr.bf16.mxu0 %v1243_v0  ;;  %915 = vmatprep.subr.bf16.mxu1 %v1243_v0  ;;  %p1173_p10 = pnand %p1172_p2, %p1166_p9 }
  0x75   : > { %896 = vmatpush3.bf16.msra.mxu0 %v1035_v5  ;;  %916 = vmatpush3.bf16.msra.mxu1 %v1044_v10 }
  0x76   : > { %897 = vmatprep.subr.bf16.mxu0 %v1243_v0  ;;  %917 = vmatprep.subr.bf16.mxu1 %v1243_v0 }
  0x79   : > { %898 = vmatpush3.bf16.msra.mxu0 %v1036_v7  ;;  %918 = vmatpush3.bf16.msra.mxu1 %v1045_v12 }
  0x7a   : > { %899 = vmatprep.subr.bf16.mxu0 %v1243_v0  ;;  %919 = vmatprep.subr.bf16.mxu1 %v1243_v0 }
  0x7d   : > { %900 = vmatpush3.bf16.msra.mxu0 %v1037_v9  ;;  %920 = vmatpush3.bf16.msra.mxu1 %v1046_v15 }
  0x7e   : > { %901 = vmatprep.subr.bf16.mxu0 %v1243_v0  ;;  %921 = vmatprep.subr.bf16.mxu1 %v1243_v0 }
  0x81   : > { %902 = vmatpush3.bf16.msra.mxu0 %v1038_v11  ;;  %922 = vmatpush3.bf16.msra.mxu1 %v1047_v16 }
  0x82   : > { %903 = vmatprep.subr.bf16.mxu0 %v1243_v0  ;;  %923 = vmatprep.subr.bf16.mxu1 %v1243_v0 }
  0x85   : > { %904 = vmatpush3.bf16.msra.mxu0 %v1039_v13  ;;  %924 = vmatpush3.bf16.msra.mxu1 %v1048_v17 }
  0x86   : > { %929 = vmatprep.subr.bf16.mxu0 %v1243_v0 }
  0x88   : > { %906 = vmatmul.mubr.bf16.vlgmr.msra.gmra.mxu0 %v1040_v14 }
  0x89   : > { %945 = vmatprep.mubr.msk.bf16.mxu0 %vm1244_vm0, %v1243_v0  ;;  %930 = vmatpush3.bf16.msra.mxu0 %v1049_v18 }
  0x8a   : > { %931 = vmatprep.subr.bf16.mxu0 %v1243_v0 }
  0x8d   : > { %932 = vmatpush3.bf16.msra.mxu0 %v1050_v19 }
  0x8e   : > { %933 = vmatprep.subr.bf16.mxu0 %v1243_v0 }
  0x91   : > { %934 = vmatpush3.bf16.msra.mxu0 %v1051_v20 }
  0x92   : > { %935 = vmatprep.subr.bf16.mxu0 %v1243_v0 }
  0x95   : > { %936 = vmatpush3.bf16.msra.mxu0 %v1052_v21 }
  0x96   : > { %937 = vmatprep.subr.bf16.mxu0 %v1243_v0 }
  0x99   : > { %938 = vmatpush3.bf16.msra.mxu0 %v1053_v22 }
  0x9a   : > { %939 = vmatprep.subr.bf16.mxu0 %v1243_v0 }
  0x9d   : > { %940 = vmatpush3.bf16.msra.mxu0 %v1054_v33 }
  0x9e   : > { %941 = vmatprep.subr.bf16.mxu0 %v1243_v0 }
  0xa1   : > { %942 = vmatpush3.bf16.msra.mxu0 %v1055_v34 }
  0xa2   : > { %943 = vmatprep.subr.bf16.mxu0 %v1243_v0 }
  0xa5   : > { %944 = vmatpush3.bf16.msra.mxu0 %v1056_v35 }
 0x148   : > { %v457_v24 = vpop.f32.mrf.mxu0 }
 0x149   : > { %v458_v26 = vadd.f32 %v827_v23, %v457_v24 }
 0x14a   : > { %v907_v25 = vpop.f32.mrf.mxu0 }
 0x14b   : > { %v464_v30 = vmax.f32 %v458_v26, 0.0 }
 0x14c   : > { %v460_v27 = vpop.f32.mrf.mxu0 }
 0x14d   : > { %v461_v28 = vadd.f32 %v827_v23, %v460_v27 }
 0x14e   : > { %v908_v29 = vpop.f32.mrf.mxu0 }
 0x14f   : > { %v465_v31 = vmax.f32 %v461_v28, 0.0 }
 0x151   : > { %v466_v32 = vpack.c.bf16 %v465_v31, %v464_v30 }
 0x153   : > { %926 = vmatmul.mubr.bf16.vlgmr.msra.gmra.mxu1 %v466_v32 }
 0x213   : > { %v572_v37 = vpop.f32.mrf.mxu1 }
 0x214   : > { %v573_v39 = vadd.f32 %v837_v36, %v572_v37 }
 0x215   : > { %v927_v38 = vpop.f32.mrf.mxu1 }
 0x216   : > { %v579_v43 = vmax.f32 %v573_v39, 0.0 }
 0x217   : > { %v575_v40 = vpop.f32.mrf.mxu1 }
 0x218   : > { %v576_v41 = vadd.f32 %v837_v36, %v575_v40 }
 0x219   : > { %v928_v42 = vpop.f32.mrf.mxu1 }
 0x21a   : > { %v580_v44 = vmax.f32 %v576_v41, 0.0 }
 0x21c   : > { %v581_v45 = vpack.c.bf16 %v580_v44, %v579_v43 }
 0x21e   : > { %946 = vmatmul.mubr.bf16.vlgmr.msra.gmra.mxu0 %v581_v45 }
 0x2de   : > { %v687_v47 = vpop.f32.mrf.mxu0 }
 0x2df   : > { %v688_v48 = vadd.f32 %v846_v46, %v687_v47 }
 0x2e0   : > { %v947_v49 = vpop.f32.mrf.mxu0 }
 0x2e1   : > { %694 = vst [vmem:[%s340_s21] sm:$0xff] %v688_v48 }
 0x2e2   : > { %v690_v50 = vpop.f32.mrf.mxu0 }
 0x2e3   : > { %v691_v51 = vadd.f32 %v846_v46, %v690_v50 }
 0x2e4   : > { %v948_v52 = vpop.f32.mrf.mxu0 }
 0x2e5   : > { %695 = vst [vmem:[%s340_s21 + $0x8] sm:$0xff] %v691_v51 }
 0x2e6   : > { %1176 = shalt.err (!%p1173_p10)
}
 0x2e7   : > { %s1177_s13 = scalar_lea.hbm %s1500_s16, 256  ;;  %s1181_s11 = scalar_lea.hbm %s1550_s7, 512 }
 0x2e8   : > { %p1178_p6 = scmp.ne.s32.totalorder %s1500_s16, %s1177_s13  ;;  %p1182_p3 = scmp.lt.s32.totalorder %s1500_s16, %s1550_s7 }
 0x2e9   : > { %p1183_p11 = scmp.lt.s32.totalorder %s1181_s11, %s1177_s13 }
 0x2ea   : > { %p1179_p4 = pnand %p1178_p6, %p1573_p1 }
 0x2eb   : > { %p1184_p5 = por %p1183_p11, %p1182_p3 }
 0x2ec   : > { %p1180_p8 = pneg %p1179_p4 }
 0x2ee   : > { %p1185_p7 = pnand %p1184_p5, %p1180_p8 }
 0x2f0   : > { %1188 = shalt.err (!%p1185_p7)
}
 0x2f1   : > { %s1246_s23 = smov 128   ;;  %s1247_s1 = smov 8  }
 0x2f2   : > { %963 = dma.vmem_to_hbm [thread:$0]  (%p1573_p1), %s1495_s22, 256, %s1500_s16, %s697_s29, %s1246_s23, %s1246_s23, %s1247_s1  }
 0x2f3 PF: > { %s725_s30 = sand.u32 1, %s1223_s24   ;;  %p1574_p12 = scmp.ne.s32.totalorder %s1559_s8, 0 }
 0x2f4   : > { %p1575_p9 = scmp.ge.s32.totalorder %s1235_s27, 2  ;;  %s726_s28 = scalar_lea.sflag [#allocation4], %s725_s30 }
 0x2f6   : > { %p980_p13 = pnand %p1575_p9, %p1574_p12 }
 0x2f8   : > { %p981_p0 = pneg %p980_p13 }
 0x2fa   : > { %1218 = dma.done.wait (%p981_p0), %s726_s28, 256  }
 0x2fb   : > { %1220 = vsyncadd (%p981_p0), %s726_s28, 4294967040  ;;  %p22_p2 = scmp.ge.s32.totalorder %s1377_s14, 4   ;;  %s1576_s24 = smov %s1227_s25 }
 0x2fc   : > { %s1577_s25 = smov %s1231_s26  ;;  %s1578_s26 = smov %s1387_s17 }
 0x2fd   : > { %s1579_s27 = smov %s1377_s14  ;;  %24 = sbr.rel (!%p22_p2) target bundleno = 9 (0x9), region = 105 }
 0x302   :  { %731 = vsyncpa [#allocation3], 1 }
 0x303   :  { %733 = vsyncpa [#allocation3 + $0x1], 1 }
 0x304   :  { %734 = vsyncpa [#allocation6], 1 }
 0x305   :  { %735 = vsyncpa [#allocation9], 1 }
 0x306   :  { %736 = vsyncpa [#allocation4], 1 }
 0x307   :  { %738 = vsyncpa [#allocation4 + $0x1], 1 }

</bundles_post_ra>
